<compile_context>
chip_gen: v7x
topology: tpu7x:2x2x1
jax: 0.10.0
libtpu: 0.0.40
codegen_flags: <defaults>
</compile_context>

<pallas_src>
import functools

import jax
import jax.numpy as jnp
from jax import lax
from jax.experimental import pallas as pl
from jax.experimental.pallas import tpu as pltpu

_EPS = 1e-07
_LANES = 128
# ~1 MiB f32 per input tile; x2 inputs x2 pipeline buffers = 4 MiB VMEM.
# Safely below the scoped-VMEM default on v5e (16 MiB), v6e/v7x (32 MiB),
# while >= (512,128) already reaches ~85% of HBM roofline.
_MAX_TILE_ROWS = 2048


def _round_up(a: int, b: int) -> int:
    return ((a + b - 1) // b) * b


def _make_kernel(n_valid: int, tile_rows: int, needs_mask: bool):
    def kernel(recon_ref, x_ref, mu_ref, lv_ref, out_ref, acc_ref):
        i = pl.program_id(0)

        @pl.when(i == 0)
        def _init():
            acc_ref[...] = jnp.zeros_like(acc_ref)

        # Upcast in-kernel (HBM traffic stays in the native dtype).
        p = jnp.clip(recon_ref[...].astype(jnp.float32), _EPS, 1.0 - _EPS)
        t = jnp.clip(x_ref[...].astype(jnp.float32), _EPS, 1.0 - _EPS)
        # binary_cross_entropy(p, t), elementwise, reduction='sum' overall.
        bce_el = -(t * jnp.log(p) + (1.0 - t) * jnp.log(1.0 - p))

        if needs_mask:
            row_ids = lax.broadcasted_iota(jnp.int32, (tile_rows, _LANES), 0)
            lane_ids = lax.broadcasted_iota(jnp.int32, (tile_rows, _LANES), 1)
            gidx = (i * tile_rows + row_ids) * _LANES + lane_ids
            bce_el = jnp.where(gidx < n_valid, bce_el, 0.0)

        # (tile_rows,128) -> (8,128): vreg-wise adds only (VPU), no XLU per step.
        acc_ref[...] += jnp.sum(
            bce_el.reshape(tile_rows // 8, 8, _LANES), axis=0
        )

        @pl.when(i == pl.num_programs(0) - 1)
        def _finalize():
            mu = mu_ref[...].astype(jnp.float32)
            lv = lv_ref[...].astype(jnp.float32)
            kld = 0.5 * jnp.sum(jnp.exp(lv * 0.5) + mu * mu - lv - 1.0)
            out_ref[0, 0] = jnp.sum(acc_ref[...]) + kld

    return kernel


def vae_loss(recon_x, x, mu, logvar):
    """Pallas TPU implementation of LossFunction.forward. Returns a scalar."""
    n = recon_x.size
    assert x.size == n, "recon_x and x must have the same number of elements"

    rows_needed = max(1, -(-n // _LANES))
    tile_rows = min(_MAX_TILE_ROWS, _round_up(rows_needed, 8))
    padded_rows = _round_up(rows_needed, tile_rows)
    num_tiles = padded_rows // tile_rows
    pad_elems = padded_rows * _LANES - n

    recon_flat = recon_x.reshape(-1)
    x_flat = x.reshape(-1)
    if pad_elems:
        recon_flat = jnp.pad(recon_flat, (0, pad_elems))
        x_flat = jnp.pad(x_flat, (0, pad_elems))
    recon2d = recon_flat.reshape(padded_rows, _LANES)
    x2d = x_flat.reshape(padded_rows, _LANES)

    mu2d = mu.reshape(mu.shape[0], -1)
    lv2d = logvar.reshape(logvar.shape[0], -1)

    kernel = _make_kernel(n, tile_rows, pad_elems > 0)

    grid_spec = pltpu.PrefetchScalarGridSpec(
        num_scalar_prefetch=0,
        grid=(num_tiles,),
        in_specs=[
            pl.BlockSpec((tile_rows, _LANES), lambda i: (i, 0)),
            pl.BlockSpec((tile_rows, _LANES), lambda i: (i, 0)),
            # mu/logvar: full-array blocks, same block every step (resident).
            pl.BlockSpec(mu2d.shape, lambda i: (0, 0)),
            pl.BlockSpec(lv2d.shape, lambda i: (0, 0)),
        ],
        out_specs=pl.BlockSpec(memory_space=pltpu.MemorySpace.SMEM),
        scratch_shapes=[pltpu.VMEM((8, _LANES), jnp.float32)],
    )

    bytes_accessed = int(
        recon2d.size * recon2d.dtype.itemsize
        + x2d.size * x2d.dtype.itemsize
        + mu2d.size * mu2d.dtype.itemsize
        + lv2d.size * lv2d.dtype.itemsize
        + 4
    )
    cost = pl.CostEstimate(
        flops=10 * n + 6 * int(mu.size),
        transcendentals=2 * n + int(mu.size),
        bytes_accessed=bytes_accessed,
    )

    # TODO(synk): on v7x (2 TCs/chip) a leading 'parallel' grid axis with
    # per-core partial sums could ~2x the EUP-bound log work; kept single-core
    # here for generation-agnostic simplicity.
    out = pl.pallas_call(
        kernel,
        out_shape=jax.ShapeDtypeStruct((1, 1), jnp.float32),
        grid_spec=grid_spec,
        compiler_params=pltpu.CompilerParams(
            dimension_semantics=("arbitrary",),
            vmem_limit_bytes=32 * 1024 * 1024,
        ),
        cost_estimate=cost,
    )(recon2d, x2d, mu2d, lv2d)
    return out[0, 0]


def _reference_loss(recon_x, x, mu, logvar):
    p = jnp.clip(recon_x.astype(jnp.float32), _EPS, 1.0 - _EPS)
    t = jnp.clip(x.astype(jnp.float32), _EPS, 1.0 - _EPS)
    bce = -jnp.sum(t * jnp.log(p) + (1.0 - t) * jnp.log(1.0 - p))
    mu = mu.astype(jnp.float32)
    logvar = logvar.astype(jnp.float32)
    kld = 0.5 * jnp.sum(jnp.exp(logvar / 2.0) + mu ** 2 - logvar - 1.0)
    return bce + kld


def _check(shape, latent, key, rtol, atol):
    k1, k2, k3, k4 = jax.random.split(key, 4)
    recon_x = jax.nn.sigmoid(jax.random.normal(k1, shape, jnp.float32))
    x = jax.random.uniform(k2, shape, jnp.float32)
    mu = jax.random.normal(k3, (shape[0], latent), jnp.float32)
    logvar = 0.5 * jax.random.normal(k4, (shape[0], latent), jnp.float32)

    loss = jax.block_until_ready(vae_loss(recon_x, x, mu, logvar))
    ref = _reference_loss(recon_x, x, mu, logvar)
    assert jnp.isfinite(loss), ("loss is not finite", shape)
    assert jnp.allclose(loss, ref, rtol=rtol, atol=atol), (shape, loss, ref)


if __name__ == "__main__":
    key = jax.random.PRNGKey(0)
    k_a, k_b, k_c = jax.random.split(key, 3)

    # Base case from the module: NCHW image batch + (B, latent) stats.
    _check((2, 4, 16, 16), 32, k_a, rtol=1e-5, atol=1e-3)
    # Non-multiple-of-128 element count -> exercises pad+mask path.
    _check((2, 3, 17, 19), 32, k_b, rtol=1e-5, atol=1e-3)
    # Larger input -> exercises the multi-tile grid / accumulator path.
    _check((4, 8, 128, 128), 32, k_c, rtol=1e-4, atol=1e-1)

    print("KERNEL_OK")
</pallas_src>

<mosaic_0001>
module attributes {stable_mosaic.version = 11 : i64} {
  func.func @kernel(%arg0: i32, %arg1: memref<16x128xf32, #tpu.memory_space<vmem>>, %arg2: memref<16x128xf32, #tpu.memory_space<vmem>>, %arg3: memref<2x32xf32, #tpu.memory_space<vmem>>, %arg4: memref<2x32xf32, #tpu.memory_space<vmem>>, %arg5: memref<1x1xf32, #tpu.memory_space<smem>>, %arg6: memref<8x128xf32, #tpu.memory_space<vmem>>) attributes {dimension_semantics = [#tpu.dimension_semantics<arbitrary>], iteration_bounds = array<i64: 1>, scalar_prefetch = 0 : i64, scratch_operands = 1 : i64, tpu.core_type = #tpu.core_type<tc>, window_params = [{transform_indices = @transform_0, window_bounds = array<i64: 16, 128>}, {transform_indices = @transform_1, window_bounds = array<i64: 16, 128>}, {pipeline_mode = #tpu.pipeline_mode<synchronous>, transform_indices = @transform_2, window_bounds = array<i64: 2, 32>}, {pipeline_mode = #tpu.pipeline_mode<synchronous>, transform_indices = @transform_3, window_bounds = array<i64: 2, 32>}, {transform_indices = @transform_4, window_bounds = array<i64: 1, 1>}]} {
    %c0_i32 = arith.constant 0 : i32
    %0 = arith.cmpi eq, %arg0, %c0_i32 : i32
    %1 = arith.extui %0 : i1 to i32
    %c0_i32_0 = arith.constant 0 : i32
    %2 = arith.cmpi ne, %1, %c0_i32_0 : i32
    scf.if %2 {
      %cst_17 = arith.constant 0.000000e+00 : f32
      %32 = vector.broadcast %cst_17 : f32 to vector<8x128xf32>
      %c0_18 = arith.constant 0 : index
      %c0_19 = arith.constant 0 : index
      %33 = vector.load %arg6[%c0_18, %c0_19] : memref<8x128xf32, #tpu.memory_space<vmem>>, vector<8x128xf32>
      tpu.vector_store %arg6[%c0_18, %c0_19], %32 {strides = array<i32>} : memref<8x128xf32, #tpu.memory_space<vmem>>, vector<8x128xf32>,
    } else {
    }
    %c0 = arith.constant 0 : index
    %c0_1 = arith.constant 0 : index
    %3 = vector.load %arg1[%c0, %c0_1] : memref<16x128xf32, #tpu.memory_space<vmem>>, vector<16x128xf32>
    %cst = arith.constant 1.000000e-07 : f32
    %cst_2 = arith.constant 0.99999988 : f32
    %4 = vector.broadcast %cst : f32 to vector<16x128xf32>
    %5 = arith.maximumf %4, %3 : vector<16x128xf32>
    %6 = vector.broadcast %cst_2 : f32 to vector<16x128xf32>
    %7 = arith.minimumf %6, %5 : vector<16x128xf32>
    %c0_3 = arith.constant 0 : index
    %c0_4 = arith.constant 0 : index
    %8 = vector.load %arg2[%c0_3, %c0_4] : memref<16x128xf32, #tpu.memory_space<vmem>>, vector<16x128xf32>
    %cst_5 = arith.constant 1.000000e-07 : f32
    %cst_6 = arith.constant 0.99999988 : f32
    %9 = vector.broadcast %cst_5 : f32 to vector<16x128xf32>
    %10 = arith.maximumf %9, %8 : vector<16x128xf32>
    %11 = vector.broadcast %cst_6 : f32 to vector<16x128xf32>
    %12 = arith.minimumf %11, %10 : vector<16x128xf32>
    %13 = math.log %7 : vector<16x128xf32>
    %14 = arith.mulf %12, %13 : vector<16x128xf32>
    %cst_7 = arith.constant 1.000000e+00 : f32
    %15 = vector.broadcast %cst_7 : f32 to vector<16x128xf32>
    %16 = arith.subf %15, %12 : vector<16x128xf32>
    %cst_8 = arith.constant 1.000000e+00 : f32
    %17 = vector.broadcast %cst_8 : f32 to vector<16x128xf32>
    %18 = arith.subf %17, %7 : vector<16x128xf32>
    %19 = math.log %18 : vector<16x128xf32>
    %20 = arith.mulf %16, %19 : vector<16x128xf32>
    %21 = arith.addf %14, %20 : vector<16x128xf32>
    %cst_9 = arith.constant 0.000000e+00 : f32
    %22 = vector.broadcast %cst_9 : f32 to vector<16x128xf32>
    %23 = arith.subf %22, %21 : vector<16x128xf32>
    %c0_10 = arith.constant 0 : index
    %c0_11 = arith.constant 0 : index
    %24 = vector.load %arg6[%c0_10, %c0_11] : memref<8x128xf32, #tpu.memory_space<vmem>>, vector<8x128xf32>
    %25 = vector.shape_cast %23 : vector<16x128xf32> to vector<2x8x128xf32>
    %cst_12 = arith.constant dense<0.000000e+00> : vector<8x128xf32>
    %26 = vector.multi_reduction <add>, %25, %cst_12 [0] : vector<2x8x128xf32> to vector<8x128xf32>
    %27 = arith.addf %24, %26 : vector<8x128xf32>
    %c0_13 = arith.constant 0 : index
    %c0_14 = arith.constant 0 : index
    %28 = vector.load %arg6[%c0_13, %c0_14] : memref<8x128xf32, #tpu.memory_space<vmem>>, vector<8x128xf32>
    tpu.vector_store %arg6[%c0_13, %c0_14], %27 {strides = array<i32>} : memref<8x128xf32, #tpu.memory_space<vmem>>, vector<8x128xf32>,
    %c0_i32_15 = arith.constant 0 : i32
    %29 = arith.cmpi eq, %arg0, %c0_i32_15 : i32
    %30 = arith.extui %29 : i1 to i32
    %c0_i32_16 = arith.constant 0 : i32
    %31 = arith.cmpi ne, %30, %c0_i32_16 : i32
    scf.if %31 {
      %c0_17 = arith.constant 0 : index
      %c0_18 = arith.constant 0 : index
      %32 = vector.load %arg3[%c0_17, %c0_18] : memref<2x32xf32, #tpu.memory_space<vmem>>, vector<2x32xf32>
      %c0_19 = arith.constant 0 : index
      %c0_20 = arith.constant 0 : index
      %33 = vector.load %arg4[%c0_19, %c0_20] : memref<2x32xf32, #tpu.memory_space<vmem>>, vector<2x32xf32>
      %cst_21 = arith.constant 5.000000e-01 : f32
      %34 = vector.broadcast %cst_21 : f32 to vector<2x32xf32>
      %35 = arith.mulf %33, %34 : vector<2x32xf32>
      %36 = math.exp %35 : vector<2x32xf32>
      %37 = arith.mulf %32, %32 : vector<2x32xf32>
      %38 = arith.addf %36, %37 : vector<2x32xf32>
      %39 = arith.subf %38, %33 : vector<2x32xf32>
      %cst_22 = arith.constant 1.000000e+00 : f32
      %40 = vector.broadcast %cst_22 : f32 to vector<2x32xf32>
      %41 = arith.subf %39, %40 : vector<2x32xf32>
      %42 = vector.shape_cast %41 : vector<2x32xf32> to vector<1x2x32xf32>
      %cst_23 = arith.constant dense<0.000000e+00> : vector<1xf32>
      %43 = vector.multi_reduction <add>, %42, %cst_23 [1, 2] : vector<1x2x32xf32> to vector<1xf32>
      %44 = vector.shape_cast %43 : vector<1xf32> to vector<1x1x1xf32>
      %45 = vector.extract %44[0, 0, 0] : f32 from vector<1x1x1xf32>
      %cst_24 = arith.constant 5.000000e-01 : f32
      %46 = arith.mulf %cst_24, %45 : f32
      %c0_25 = arith.constant 0 : index
      %c0_26 = arith.constant 0 : index
      %47 = vector.load %arg6[%c0_25, %c0_26] : memref<8x128xf32, #tpu.memory_space<vmem>>, vector<8x128xf32>
      %48 = vector.shape_cast %47 : vector<8x128xf32> to vector<1x8x128xf32>
      %cst_27 = arith.constant dense<0.000000e+00> : vector<1xf32>
      %49 = vector.multi_reduction <add>, %48, %cst_27 [1, 2] : vector<1x8x128xf32> to vector<1xf32>
      %50 = vector.shape_cast %49 : vector<1xf32> to vector<1x1x1xf32>
      %51 = vector.extract %50[0, 0, 0] : f32 from vector<1x1x1xf32>
      %52 = arith.addf %51, %46 : f32
      %c0_28 = arith.constant 0 : index
      %c0_29 = arith.constant 0 : index
      %53 = memref.load %arg5[%c0_28, %c0_29] : memref<1x1xf32, #tpu.memory_space<smem>>
      memref.store %52, %arg5[%c0_28, %c0_29] : memref<1x1xf32, #tpu.memory_space<smem>>
    } else {
    }
    return
  }
  func.func @transform_0(%arg0: i32) -> (i32, i32) {
    %c0_i32 = arith.constant 0 : i32
    %c0_i32_0 = arith.constant 0 : i32
    return %arg0, %c0_i32 : i32, i32
  }
  func.func @transform_1(%arg0: i32) -> (i32, i32) {
    %c0_i32 = arith.constant 0 : i32
    %c0_i32_0 = arith.constant 0 : i32
    return %arg0, %c0_i32 : i32, i32
  }
  func.func @transform_2(%arg0: i32) -> (i32, i32) {
    %c0_i32 = arith.constant 0 : i32
    %c0_i32_0 = arith.constant 0 : i32
    %c0_i32_1 = arith.constant 0 : i32
    return %c0_i32, %c0_i32_0 : i32, i32
  }
  func.func @transform_3(%arg0: i32) -> (i32, i32) {
    %c0_i32 = arith.constant 0 : i32
    %c0_i32_0 = arith.constant 0 : i32
    %c0_i32_1 = arith.constant 0 : i32
    return %c0_i32, %c0_i32_0 : i32, i32
  }
  func.func @transform_4(%arg0: i32) -> (i32, i32) {
    %c0_i32 = arith.constant 0 : i32
    %c0_i32_0 = arith.constant 0 : i32
    %c0_i32_1 = arith.constant 0 : i32
    return %c0_i32, %c0_i32_0 : i32, i32
  }
}

</mosaic_0001>

<bundles_post_ra>
// kernel: tpu_custom_call.1
= control target key start
LH: loop header
LB: loop body
LE: loop exit
PB: predicated region body
PF: predicated region fallthrough
CT: control target
= control target key end

     0   :  { %9 = vsyncpa [#allocation4], 0  ;;  %s291_s0 = inlined_call_operand.hbm [shape: f32[16,128], index: 0, kind: input, shape index: {}]   ;;  %s292_s1 = inlined_call_operand.hbm [shape: f32[16,128], index: 1, kind: input, shape index: {}]   ;;  %s293_s2 = inlined_call_operand.vmem [shape: f32[2,32], index: 2, kind: input, shape index: {}]   ;;  %s294_s3 = inlined_call_operand.vmem [shape: f32[2,32], index: 3, kind: input, shape index: {}]   ;;  %s295_s4 = inlined_call_operand.hbm [shape: f32[1,1], index: 4, kind: output, shape index: {}]  }
   0x1   :  { %10 = vsyncpa [#allocation7], 0 }
   0x2   :  { %11 = vsyncpa [#allocation5], 0  ;;  %s219_s15 = smov [#allocation3]   ;;  %s159_s19 = scalar_lea.hbm %s291_s0, 256 }
   0x3   :  { %s17_s16 = sshll.u32 %s219_s15, 4  ;;  %p160_p0 = scmp.ne.s32.totalorder %s291_s0, %s159_s19  ;;  %s18_s16 = int_to_ptr.vmem [resolvable:$true] %s17_s16 }
   0x4   :  { %p163_p1 = scmp.lt.u32.totalorder %s159_s19, %s291_s0 }
   0x6   :  { %p165_p2 = pnand %p163_p1, %p160_p0 }
   0x8   :  { %168 = shalt.err (!%p165_p2)
}
   0x9   :  { %s169_s24 = scalar_lea.vmem %s18_s16, 256  ;;  %p174_p4 = scmp.lt.s32.totalorder %s18_s16, %s18_s16 }
   0xa   :  { %p170_p3 = scmp.ne.s32.totalorder %s18_s16, %s169_s24  ;;  %p175_p5 = scmp.lt.s32.totalorder %s169_s24, %s169_s24 }
   0xc   :  { %p176_p6 = por %p175_p5, %p174_p4 }
   0xe   :  { %p177_p7 = pnand %p176_p6, %p170_p3 }
  0x10   :  { %180 = shalt.err (!%p177_p7)
}
  0x11   :  { %s220_s25 = smov 128   ;;  %s221_s26 = smov 8  }
  0x12   :  { %23 = dma.hbm_to_vmem [thread:$0]  %s291_s0, 256, %s18_s16, [#allocation4], %s220_s25, %s220_s25, %s221_s26  }
  0x13   :  { %s222_s29 = smov [#allocation6]   ;;  %s181_s7 = scalar_lea.hbm %s292_s1, 256 }
  0x14   :  { %s29_s30 = sshll.u32 %s222_s29, 4  ;;  %p182_p8 = scmp.ne.s32.totalorder %s292_s1, %s181_s7  ;;  %s30_s30 = int_to_ptr.vmem [resolvable:$true] %s29_s30 }
  0x15   :  { %p185_p9 = scmp.lt.u32.totalorder %s181_s7, %s292_s1 }
  0x17   :  { %p187_p10 = pnand %p185_p9, %p182_p8 }
  0x19   :  { %190 = shalt.err (!%p187_p10)
}
  0x1a   :  { %s191_s12 = scalar_lea.vmem %s30_s30, 256  ;;  %p196_p12 = scmp.lt.s32.totalorder %s30_s30, %s30_s30 }
  0x1b   :  { %p192_p11 = scmp.ne.s32.totalorder %s30_s30, %s191_s12  ;;  %p197_p13 = scmp.lt.s32.totalorder %s191_s12, %s191_s12 }
  0x1d   :  { %p198_p0 = por %p197_p13, %p196_p12 }
  0x1f   :  { %p199_p1 = pnand %p198_p0, %p192_p11 }
  0x21   :  { %202 = shalt.err (!%p199_p1)
}
  0x22   :  { %35 = dma.hbm_to_vmem [thread:$0]  %s292_s1, 256, %s30_s30, [#allocation7], %s220_s25, %s220_s25, %s221_s26  }
  0x23   :  { %213 = dma.done.wait [#allocation4], 256  }
  0x24   :  { %214 = vsyncadd [#allocation4], 4294967040 }
  0x25   :  { %215 = dma.done.wait [#allocation7], 256  }
  0x26   :  { %216 = vsyncadd [#allocation7], 4294967040  ;;  %v91_v0 = vld [vmem:[%s294_s3] sm:$0x3]  ;;  %v52_v3 = vld [vmem:[#allocation3 + $0x8] sm:$0xff]  ;;  %vm99_vm0 = vcmask 254976  }
  0x27   :  { %v51_v1 = vld [vmem:[#allocation3] sm:$0xff]  ;;  %v92_v2 = vmul.f32 0.5, %v91_v0  ;;  %v54_v5 = vmax.f32 %v52_v3, 1e-07  ;;  %v57_v10 = vld [vmem:[#allocation6] sm:$0xff]  ;;  %v58_v12 = vld [vmem:[#allocation6 + $0x8] sm:$0xff] }
  0x28   :  { %v53_v4 = vmax.f32 %v51_v1, 1e-07  ;;  %v90_v13 = vld [vmem:[%s293_s2] sm:$0x3]  ;;  %v59_v14 = vmax.f32 %v57_v10, 1e-07 }
  0x29   :  { %v93_v6 = vmul.f32 1.442695, %v92_v2  ;;  %v56_v8 = vmin.f32 %v54_v5, 0.9999999  ;;  %v60_v15 = vmax.f32 %v58_v12, 1e-07  ;;  %v95_v16 = vmul.f32 %v90_v13, %v90_v13 }
  0x2a   :  { %v55_v7 = vmin.f32 %v53_v4, 0.9999999  ;;  %v61_v17 = vmin.f32 %v59_v14, 0.9999999  ;;  %s203_s21 = scalar_lea.hbm %s295_s4, 16 }
  0x2b   :  { %149 = vpow2.f32 %v93_v6  ;;  %v72_v11 = vsub.f32 1.0, %v56_v8  ;;  %v62_v18 = vmin.f32 %v60_v15, 0.9999999  ;;  %p204_p2 = scmp.ne.s32.totalorder %s295_s4, %s203_s21  ;;  %p207_p3 = scmp.lt.u32.totalorder %s203_s21, %s295_s4 }
  0x2c   :  { %v71_v9 = vsub.f32 1.0, %v55_v7  ;;  %151 = vlog2.f32 %v55_v7  ;;  %v69_v24 = vsub.f32 1.0, %v61_v17 }
  0x2d   :  { %153 = vlog2.f32 %v56_v8  ;;  %v70_v28 = vsub.f32 1.0, %v62_v18  ;;  %p209_p4 = pnand %p207_p3, %p204_p2 }
  0x2e   :  { %155 = vlog2.f32 %v71_v9 }
  0x2f   :  { %157 = vlog2.f32 %v72_v11 }
  0x35   :  { %v150_v19 = vpop.eup %149 }
  0x36   :  { %v152_v20 = vpop.eup %151  ;;  %v96_v21 = vadd.f32 %v150_v19, %v95_v16 }
  0x37   :  { %v154_v22 = vpop.eup %153  ;;  %v64_v23 = vmul.f32 0.6931472, %v152_v20 }
  0x38   :  { %v156_v25 = vpop.eup %155  ;;  %v97_v26 = vsub.f32 %v96_v21, %v91_v0  ;;  %v66_v27 = vmul.f32 0.6931472, %v154_v22 }
  0x39   :  { %v158_v29 = vpop.eup %157  ;;  %v67_v30 = vmul.f32 %v64_v23, %v61_v17  ;;  %v74_v31 = vmul.f32 0.6931472, %v156_v25 }
  0x3a   :  { %v139_v32 = vadd.f32 -1.0, %v97_v26  ;;  %v68_v33 = vmul.f32 %v66_v27, %v62_v18  ;;  %v76_v34 = vmul.f32 0.6931472, %v158_v29 }
  0x3b   :  { %v77_v35 = vmul.f32 %v74_v31, %v69_v24 }
  0x3c   :  { %v100_v36 = vsel %vm99_vm0, %v139_v32, 0.0  ;;  %v78_v37 = vmul.f32 %v76_v34, %v70_v28 }
  0x3d   :  { %101 = vadd.xlane.f32.xlu0 %v100_v36  ;;  %v79_v38 = vadd.f32 %v77_v35, %v67_v30 }
  0x3e   :  { %v80_v39 = vadd.f32 %v78_v37, %v68_v33 }
  0x3f   :  { %v81_v40 = vsub.f32 0.0, %v79_v38 }
  0x40   :  { %v82_v41 = vsub.f32 0.0, %v80_v39 }
  0x42   :  { %v84_v42 = vadd.f32 %v82_v41, %v81_v40 }
  0x44   :  { %112 = vadd.xlane.f32.xlu0 %v84_v42 }
  0xca   :  { %v102_v43 = vpop.xlane.xlu0 %101 }
  0xcb   :  { %v103_v44 = vrot.slane %v102_v43, 4 }
  0xcd   :  { %v104_v45 = vadd.f32 %v103_v44, %v102_v43 }
  0xcf   :  { %v105_v46 = vrot.slane %v104_v45, 2 }
  0xd1   :  { %v113_v47 = vpop.xlane.xlu0 %112  ;;  %v106_v48 = vadd.f32 %v105_v46, %v104_v45 }
  0xd2   :  { %v114_v49 = vrot.slane %v113_v47, 4 }
  0xd3   :  { %v107_v50 = vrot.slane %v106_v48, 1 }
  0xd4   :  { %v115_v51 = vadd.f32 %v114_v49, %v113_v47 }
  0xd5   :  { %v108_v52 = vadd.f32 %v107_v50, %v106_v48 }
  0xd6   :  { %v116_v53 = vrot.slane %v115_v51, 2 }
  0xd7   :  { %140 = vpush %v108_v52 }
  0xd8   :  { %v117_v54 = vadd.f32 %v116_v53, %v115_v51 }
  0xda   :  { %v118_v55 = vrot.slane %v117_v54, 1 }
  0xdc   :  { %v119_v56 = vadd.f32 %v118_v55, %v117_v54 }
  0xde   :  { %142 = vpush %v119_v56 }
 0x108   :  { %s141_s2 = spop %140 }
 0x109   :  { %s110_s3 = smul.f32 0.5, %s141_s2 }
 0x10f   :  { %s143_s17 = spop %142 }
 0x110   :  { %s121_s18 = sadd.f32 %s143_s17, %s110_s3 }
 0x112   :  { %123 = sst [smem:[#allocation8]] %s121_s18 }
 0x113   :  { %212 = shalt.err (!%p209_p4)
}
 0x114   :  { %s223_s26 = smov [#allocation8]  }
 0x115   :  { %131 = dma.smem_to_hbm %s223_s26, 16, %s295_s4, [#allocation5]  }
 0x116   :  { %217 = dma.done.wait [#allocation5], 16  }
 0x117   :  { %218 = vsyncadd [#allocation5], 4294967280 }
 0x118   :  { %135 = sfence }
 0x119   :  { %136 = vsyncpa [#allocation4], 1 }
 0x11a   :  { %137 = vsyncpa [#allocation7], 1 }
 0x11b   :  { %138 = vsyncpa [#allocation5], 1 }

</bundles_post_ra>
